<compile_context>
chip_gen: v7x
topology: tpu7x:2x2x1
jax: 0.10.0
libtpu: 0.0.40
codegen_flags: <defaults>
</compile_context>

<pallas_src>
import functools

import jax
import jax.numpy as jnp
from jax.experimental import pallas as pl
from jax.experimental.pallas import tpu as pltpu

BETA_DEFAULT = 2.0        # MMCE(beta=2.0) default
_INV_BANDWIDTH = 2.5      # Laplacian kernel exp(-|p_i - p_j| / 0.4)
_PAIR_TILE_DEFAULT = 512  # pair-block edge: f32 tile ~= 1 MiB


def _round_up(x, m):
    return ((x + m - 1) // m) * m


# ---------------------------------------------------------------------------
# Pass 1: per-row statistics (grid over batch tiles).
# stats columns: [e_plus, e_minus, w_c, w_i, ce_row, correct, conf, valid]
# ---------------------------------------------------------------------------
def _row_stats_kernel(logits_ref, tgt_ref, stats_ref, *, b_real, tile_b):
    logits = logits_ref[...].astype(jnp.float32)              # (TB, C)
    tgt = tgt_ref[...]                                         # (TB, 1) int32
    tb, c = logits.shape

    class_iota = jax.lax.broadcasted_iota(jnp.int32, (tb, c), 1)
    onehot = (class_iota == tgt).astype(jnp.float32)           # built in-kernel

    row_max = jnp.max(logits, axis=-1, keepdims=True)          # (TB, 1)
    lse = jnp.log(jnp.sum(jnp.exp(logits - row_max), axis=-1, keepdims=True))

    # Per-row cross-entropy term: logsumexp - target logit.
    tgt_logit = jnp.sum(onehot * logits, axis=-1, keepdims=True)
    ce_row = row_max + lse - tgt_logit                         # (TB, 1)

    # top-1 softmax confidence: max(softmax(x)) == exp(-lse_shifted)
    conf = jnp.exp(-lse)                                       # (TB, 1)

    # predicted label = index of first maximal logit (PyTorch tie-breaking).
    # (`tgt_logit == row_max` would be cheaper but changes exact-tie semantics.)
    class_iota_f = class_iota.astype(jnp.float32)
    pred = jnp.min(jnp.where(logits == row_max, class_iota_f, jnp.float32(c)),
                   axis=-1, keepdims=True)                     # (TB, 1)
    correct = (pred.astype(jnp.int32) == tgt).astype(jnp.float32)  # int compare

    # Mask batch-padding rows so they contribute nothing downstream.
    row_idx = (pl.program_id(0) * tile_b
               + jax.lax.broadcasted_iota(jnp.int32, (tb, 1), 0))
    valid = (row_idx < b_real).astype(jnp.float32)

    w_c = valid * correct * (1.0 - conf)        # weights on the correct set
    w_i = valid * (1.0 - correct) * conf        # weights on the incorrect set

    # Separable halves of the Laplacian kernel -> only O(B) exps on the EUP.
    e_plus = jnp.exp(jnp.float32(_INV_BANDWIDTH) * conf)
    e_minus = jnp.exp(jnp.float32(-_INV_BANDWIDTH) * conf)

    stats_ref[...] = jnp.concatenate(
        [e_plus, e_minus, w_c, w_i, valid * ce_row, valid * correct, conf, valid],
        axis=-1)


# ---------------------------------------------------------------------------
# Pass 2: tiled B x B pairwise contraction.
# kw[:, 0] = sum_j K(p_i, p_j) * w_c[j],   kw[:, 1] = sum_j K(p_i, p_j) * w_i[j]
# ---------------------------------------------------------------------------
def _pair_kernel(stats_i_ref, stats_j_ref, kw_ref, *, mxu_dtype):
    @pl.when(pl.program_id(1) == 0)
    def _():
        kw_ref[...] = jnp.zeros_like(kw_ref)

    si = stats_i_ref[...]                        # (TI, 8)
    sj = stats_j_ref[...]                        # (TJ, 8)

    e_plus_i, e_minus_i = si[:, 0:1], si[:, 1:2]
    e_plus_j, e_minus_j = sj[:, 0:1], sj[:, 1:2]
    w_j = sj[:, 2:4]                             # (TJ, 2): [w_c, w_i]

    # exp(-|p_i - p_j| / 0.4) == min(e-_i * e+_j, e+_i * e-_j): outer products
    # on the MXU (K=1 dot_general), min on the VPU, no per-pair exp on the EUP.
    dn = (((1,), (1,)), ((), ()))
    a = jax.lax.dot_general(e_minus_i, e_plus_j, dn,
                            preferred_element_type=jnp.float32)
    b = jax.lax.dot_general(e_plus_i, e_minus_j, dn,
                            preferred_element_type=jnp.float32)
    kmat = jnp.minimum(a, b)                     # (TI, TJ)

    # One fused (TI,TJ) x (TJ,2) MXU contraction gives both weighted row sums.
    kw_ref[...] += jnp.dot(kmat.astype(mxu_dtype), w_j.astype(mxu_dtype),
                           preferred_element_type=jnp.float32)


# ---------------------------------------------------------------------------
# Pass 3: scalar reductions + MMCE formula (gridless, SMEM scalar output).
# ---------------------------------------------------------------------------
def _finalize_kernel(stats_ref, kw_ref, out_ref, *, b_real, beta):
    stats = stats_ref[...]                       # (B_pad, 8)
    kw = kw_ref[...]                             # (B_pad, 2)

    w_c, w_i = stats[:, 2:3], stats[:, 3:4]
    ce_rows, correct = stats[:, 4:5], stats[:, 5:6]
    k_wc, k_wi = kw[:, 0:1], kw[:, 1:2]

    f_b = jnp.float32(b_real)
    ce = jnp.sum(ce_rows) / f_b                  # CrossEntropyLoss (mean)

    k = jnp.sum(correct)                         # number of correct predictions
    kp = f_b - k                                 # number of incorrect predictions
    cond = ((k > 0.0) & (kp > 0.0)).astype(jnp.float32)

    sum_cc = jnp.sum(w_c * k_wc)                 # correct   x correct   pairs
    sum_ii = jnp.sum(w_i * k_wi)                 # incorrect x incorrect pairs
    sum_ci = jnp.sum(w_c * k_wi)                 # correct   x incorrect pairs

    # Denominators only matter when cond == 1 (kk == k, kkp == kp); the
    # max(., 1) guard keeps the cond == 0 branch finite.
    kk = jnp.maximum(k, 1.0)
    kkp = jnp.maximum(kp, 1.0)
    mean_cc = sum_cc / (kk * kk)
    mean_ii = sum_ii / (kkp * kkp)
    mean_ci = sum_ci / (kk * kkp)

    # NOTE: the double normalisation (mean over the k x k kernel block, then
    # another /(k^2 + 1e-5)) intentionally matches the reference MMCE code.
    mmd = (mean_cc / (k * k + 1e-5)
           + mean_ii / (kp * kp + 1e-5)
           - 2.0 * mean_ci / (k * kp + 1e-5))
    # Clamp tiny negative cancellation error so sqrt never returns NaN.
    mmd = jnp.maximum(mmd, 0.0)
    calib = jnp.maximum(cond * jnp.sqrt(mmd + 1e-10), 0.0)

    out_ref[0, 0] = ce + jnp.float32(beta) * calib


# ---------------------------------------------------------------------------
# Wrapper
# ---------------------------------------------------------------------------
def mmce_loss(logits, targets, *, beta=BETA_DEFAULT, pair_tile=None,
              row_tile=None, pair_mxu_dtype=jnp.float32):
    """MMCE forward: CE + beta * MMCE_weighted, as three Pallas passes."""
    b, c = logits.shape
    targets_2d = targets.reshape(b, 1).astype(jnp.int32)

    if pair_tile is None:
        pair_tile = _PAIR_TILE_DEFAULT if b >= _PAIR_TILE_DEFAULT else _round_up(b, 8)
    b_pad = _round_up(b, pair_tile)
    if row_tile is None:
        row_tile = 256 if (pair_tile > 256 and pair_tile % 256 == 0) else pair_tile
    assert pair_tile % 8 == 0 and row_tile % 8 == 0
    assert b_pad % pair_tile == 0 and b_pad % row_tile == 0

    if b_pad != b:
        logits_p = jnp.pad(logits, ((0, b_pad - b), (0, 0)))
        targets_p = jnp.pad(targets_2d, ((0, b_pad - b), (0, 0)))
    else:
        logits_p, targets_p = logits, targets_2d

    in_bytes = jnp.dtype(logits.dtype).itemsize

    def vmem_limit(nbytes):
        # working-set estimate * headroom, clamped to a portable range
        return int(min(48 * 2**20, max(4 * nbytes, 16 * 2**20)))

    # ---- pass 1: per-row stats --------------------------------------------
    stats = pl.pallas_call(
        functools.partial(_row_stats_kernel, b_real=b, tile_b=row_tile),
        out_shape=jax.ShapeDtypeStruct((b_pad, 8), jnp.float32),
        grid=(b_pad // row_tile,),
        in_specs=[pl.BlockSpec((row_tile, c), lambda i: (i, 0)),
                  pl.BlockSpec((row_tile, 1), lambda i: (i, 0))],
        out_specs=pl.BlockSpec((row_tile, 8), lambda i: (i, 0)),
        compiler_params=pltpu.CompilerParams(
            dimension_semantics=("parallel",),
            vmem_limit_bytes=vmem_limit(
                2 * row_tile * c * (in_bytes + 4) + 2 * row_tile * 64)),
        cost_estimate=pl.CostEstimate(
            flops=int(10 * b_pad * c),
            transcendentals=int(b_pad * c + 3 * b_pad),
            bytes_accessed=int(in_bytes * b_pad * c + 36 * b_pad)),
    )(logits_p, targets_p)

    # ---- pass 2: tiled B x B pairwise contraction ---------------------------
    n_tiles = b_pad // pair_tile
    kw = pl.pallas_call(
        functools.partial(_pair_kernel, mxu_dtype=pair_mxu_dtype),
        out_shape=jax.ShapeDtypeStruct((b_pad, 2), jnp.float32),
        grid=(n_tiles, n_tiles),
        in_specs=[pl.BlockSpec((pair_tile, 8), lambda i, j: (i, 0)),
                  pl.BlockSpec((pair_tile, 8), lambda i, j: (j, 0))],
        out_specs=pl.BlockSpec((pair_tile, 2), lambda i, j: (i, 0)),
        compiler_params=pltpu.CompilerParams(
            dimension_semantics=("parallel", "arbitrary"),
            vmem_limit_bytes=vmem_limit(
                4 * pair_tile * pair_tile * 4 + 6 * pair_tile * 64)),
        cost_estimate=pl.CostEstimate(
            flops=int(9 * b_pad * b_pad),
            transcendentals=0,
            bytes_accessed=int(64 * b_pad * n_tiles + 8 * b_pad)),
    )(stats, stats)

    # ---- pass 3: scalar loss ------------------------------------------------
    loss = pl.pallas_call(
        functools.partial(_finalize_kernel, b_real=b, beta=float(beta)),
        out_shape=jax.ShapeDtypeStruct((1, 1), jnp.float32),
        in_specs=[pl.BlockSpec(memory_space=pltpu.MemorySpace.VMEM),
                  pl.BlockSpec(memory_space=pltpu.MemorySpace.VMEM)],
        out_specs=pl.BlockSpec(memory_space=pltpu.MemorySpace.SMEM),
        compiler_params=pltpu.CompilerParams(
            vmem_limit_bytes=vmem_limit(16 * b_pad * 4)),
    )(stats, kw)
    return loss[0, 0]


# ---------------------------------------------------------------------------
# Reference (plain-JAX faithful port of the PyTorch MMCE = CE + beta*MMCE_w)
# ---------------------------------------------------------------------------
def _reference_mmce(logits, targets, beta=BETA_DEFAULT):
    logits = jnp.asarray(logits, jnp.float32)
    B, C = logits.shape

    logprob = jax.nn.log_softmax(logits, axis=-1)
    ce = -jnp.mean(logprob[jnp.arange(B), targets])

    probs = jax.nn.softmax(logits, axis=-1)
    conf = jnp.max(probs, axis=-1)
    pred = jnp.argmax(probs, axis=-1)
    correct = (pred == targets).astype(jnp.float32)

    k_i = int(jnp.sum(correct))
    kp_i = B - k_i
    both = (k_i > 0) and (kp_i > 0)
    cond = 1.0 if both else 0.0
    kk = k_i if both else 2
    kkp = kp_i if both else (B - 2)

    correct_prob = jax.lax.top_k(conf * correct, kk)[0]
    incorrect_prob = jax.lax.top_k(conf * (1.0 - correct), kkp)[0]

    def lap_kernel(a, b):
        return jnp.exp(-jnp.abs(a[:, None] - b[None, :]) / 0.4)

    cc = jnp.mean(lap_kernel(correct_prob, correct_prob)
                  * ((1.0 - correct_prob)[:, None] * (1.0 - correct_prob)[None, :]))
    ii = jnp.mean(lap_kernel(incorrect_prob, incorrect_prob)
                  * (incorrect_prob[:, None] * incorrect_prob[None, :]))
    ci = jnp.mean(lap_kernel(correct_prob, incorrect_prob)
                  * ((1.0 - correct_prob)[:, None] * incorrect_prob[None, :]))

    m = float(k_i)
    n = float(kp_i)
    mmd = cc / (m * m + 1e-5) + ii / (n * n + 1e-5) - 2.0 * ci / (m * n + 1e-5)
    calib = jnp.maximum(cond * jnp.sqrt(mmd + 1e-10), 0.0)
    return ce + beta * calib


if __name__ == "__main__":
    key = jax.random.PRNGKey(0)
    B, C = 16, 10          # batch, num classes (CIFAR-10-like)

    k_logits, k_targets = jax.random.split(key)
    logits = jax.random.normal(k_logits, (B, C), dtype=jnp.float32) * 2.0
    targets = jax.random.randint(k_targets, (B,), 0, C, dtype=jnp.int32)

    # Bias the first half of the batch towards correct predictions so that the
    # batch (almost surely) contains both correct and incorrect samples.
    boost = (jnp.arange(B) < B // 2).astype(jnp.float32)[:, None] * 6.0
    logits = logits + boost * jax.nn.one_hot(targets, C, dtype=jnp.float32)

    ref = _reference_mmce(logits, targets, beta=BETA_DEFAULT)

    # 1) default path (single pair tile at this small batch size)
    loss = jax.block_until_ready(mmce_loss(logits, targets, beta=BETA_DEFAULT))
    assert jnp.allclose(loss, ref, atol=2e-4, rtol=1e-3), (loss, ref)

    # 2) multi-tile pairwise grid (2 x 2 pair blocks) exercises the tiled path
    loss_tiled = jax.block_until_ready(
        mmce_loss(logits, targets, beta=BETA_DEFAULT, pair_tile=8, row_tile=8))
    assert jnp.allclose(loss_tiled, ref, atol=2e-4, rtol=1e-3), (loss_tiled, ref)

    # 3) batch-padding path (B not a multiple of the sublane-padded tile)
    B2 = 12
    logits2, targets2 = logits[:B2], targets[:B2]
    ref2 = _reference_mmce(logits2, targets2, beta=BETA_DEFAULT)
    loss2 = jax.block_until_ready(mmce_loss(logits2, targets2, beta=BETA_DEFAULT))
    assert jnp.allclose(loss2, ref2, atol=2e-4, rtol=1e-3), (loss2, ref2)

    print("KERNEL_OK")
</pallas_src>

<mosaic_0001>
module attributes {stable_mosaic.version = 11 : i64} {
  func.func @_row_stats_kernel(%arg0: i32, %arg1: memref<16x10xf32, #tpu.memory_space<vmem>>, %arg2: memref<16x1xi32, #tpu.memory_space<vmem>>, %arg3: memref<16x8xf32, #tpu.memory_space<vmem>>) attributes {dimension_semantics = [#tpu.dimension_semantics<parallel>], iteration_bounds = array<i64: 1>, scalar_prefetch = 0 : i64, scratch_operands = 0 : i64, tpu.core_type = #tpu.core_type<tc>, window_params = [{transform_indices = @transform_0, window_bounds = array<i64: 16, 10>}, {transform_indices = @transform_1, window_bounds = array<i64: 16, 1>}, {transform_indices = @transform_2, window_bounds = array<i64: 16, 8>}]} {
    %c0 = arith.constant 0 : index
    %c0_0 = arith.constant 0 : index
    %0 = vector.load %arg1[%c0, %c0_0] : memref<16x10xf32, #tpu.memory_space<vmem>>, vector<16x10xf32>
    %c0_1 = arith.constant 0 : index
    %c0_2 = arith.constant 0 : index
    %1 = vector.load %arg2[%c0_1, %c0_2] : memref<16x1xi32, #tpu.memory_space<vmem>>, vector<16x1xi32>
    %2 = tpu.iota {dimensions = array<i32: 1>} : vector<16x10xi32>
    %3 = vector.broadcast %1 : vector<16x1xi32> to vector<16x10xi32>
    %4 = arith.cmpi eq, %2, %3 : vector<16x10xi32>
    %5 = arith.extui %4 : vector<16x10xi1> to vector<16x10xi32>
    %6 = arith.sitofp %5 : vector<16x10xi32> to vector<16x10xf32>
    %cst = arith.constant dense<0xFF800000> : vector<16xf32>
    %7 = vector.multi_reduction <maximumf>, %0, %cst [1] : vector<16x10xf32> to vector<16xf32>
    %8 = vector.shape_cast %7 : vector<16xf32> to vector<16x1xf32>
    %9 = vector.broadcast %8 : vector<16x1xf32> to vector<16x10xf32>
    %10 = arith.subf %0, %9 : vector<16x10xf32>
    %11 = math.exp %10 : vector<16x10xf32>
    %cst_3 = arith.constant dense<0.000000e+00> : vector<16xf32>
    %12 = vector.multi_reduction <add>, %11, %cst_3 [1] : vector<16x10xf32> to vector<16xf32>
    %13 = vector.shape_cast %12 : vector<16xf32> to vector<16x1xf32>
    %14 = math.log %13 : vector<16x1xf32>
    %15 = arith.mulf %6, %0 : vector<16x10xf32>
    %cst_4 = arith.constant dense<0.000000e+00> : vector<16xf32>
    %16 = vector.multi_reduction <add>, %15, %cst_4 [1] : vector<16x10xf32> to vector<16xf32>
    %17 = vector.shape_cast %16 : vector<16xf32> to vector<16x1xf32>
    %18 = arith.addf %8, %14 : vector<16x1xf32>
    %19 = arith.subf %18, %17 : vector<16x1xf32>
    %cst_5 = arith.constant 0.000000e+00 : f32
    %20 = vector.broadcast %cst_5 : f32 to vector<16x1xf32>
    %21 = arith.subf %20, %14 : vector<16x1xf32>
    %22 = math.exp %21 : vector<16x1xf32>
    %23 = arith.sitofp %2 : vector<16x10xi32> to vector<16x10xf32>
    %24 = vector.broadcast %8 : vector<16x1xf32> to vector<16x10xf32>
    %25 = arith.cmpf oeq, %0, %24 : vector<16x10xf32>
    %cst_6 = arith.constant 1.000000e+01 : f32
    %26 = vector.broadcast %cst_6 : f32 to vector<16x10xf32>
    %27 = arith.select %25, %23, %26 : vector<16x10xi1>, vector<16x10xf32>
    %cst_7 = arith.constant dense<0x7F800000> : vector<16xf32>
    %28 = vector.multi_reduction <minimumf>, %27, %cst_7 [1] : vector<16x10xf32> to vector<16xf32>
    %29 = vector.shape_cast %28 : vector<16xf32> to vector<16x1xf32>
    %30 = arith.fptosi %29 : vector<16x1xf32> to vector<16x1xi32>
    %31 = arith.cmpi eq, %30, %1 : vector<16x1xi32>
    %32 = arith.extui %31 : vector<16x1xi1> to vector<16x1xi32>
    %33 = arith.sitofp %32 : vector<16x1xi32> to vector<16x1xf32>
    %c16_i32 = arith.constant 16 : i32
    %34 = arith.muli %arg0, %c16_i32 : i32
    %35 = tpu.iota {dimensions = array<i32: 0>} : vector<16x1xi32>
    %36 = vector.broadcast %34 : i32 to vector<16x1xi32>
    %37 = arith.addi %36, %35 : vector<16x1xi32>
    %c16_i32_8 = arith.constant 16 : i32
    %38 = vector.broadcast %c16_i32_8 : i32 to vector<16x1xi32>
    %39 = arith.cmpi slt, %37, %38 : vector<16x1xi32>
    %40 = arith.extui %39 : vector<16x1xi1> to vector<16x1xi32>
    %41 = arith.sitofp %40 : vector<16x1xi32> to vector<16x1xf32>
    %42 = arith.mulf %41, %33 : vector<16x1xf32>
    %cst_9 = arith.constant 1.000000e+00 : f32
    %43 = vector.broadcast %cst_9 : f32 to vector<16x1xf32>
    %44 = arith.subf %43, %22 : vector<16x1xf32>
    %45 = arith.mulf %42, %44 : vector<16x1xf32>
    %cst_10 = arith.constant 1.000000e+00 : f32
    %46 = vector.broadcast %cst_10 : f32 to vector<16x1xf32>
    %47 = arith.subf %46, %33 : vector<16x1xf32>
    %48 = arith.mulf %41, %47 : vector<16x1xf32>
    %49 = arith.mulf %48, %22 : vector<16x1xf32>
    %cst_11 = arith.constant 2.500000e+00 : f32
    %50 = vector.broadcast %cst_11 : f32 to vector<16x1xf32>
    %51 = arith.mulf %50, %22 : vector<16x1xf32>
    %52 = math.exp %51 : vector<16x1xf32>
    %cst_12 = arith.constant -2.500000e+00 : f32
    %53 = vector.broadcast %cst_12 : f32 to vector<16x1xf32>
    %54 = arith.mulf %53, %22 : vector<16x1xf32>
    %55 = math.exp %54 : vector<16x1xf32>
    %56 = arith.mulf %41, %19 : vector<16x1xf32>
    %57 = arith.mulf %41, %33 : vector<16x1xf32>
    %58 = tpu.concatenate %52, %55, %45, %49, %56, %57, %22, %41 in 1 : vector<16x1xf32>, vector<16x1xf32>, vector<16x1xf32>, vector<16x1xf32>, vector<16x1xf32>, vector<16x1xf32>, vector<16x1xf32>, vector<16x1xf32> -> vector<16x8xf32>
    %c0_13 = arith.constant 0 : index
    %c0_14 = arith.constant 0 : index
    %59 = vector.load %arg3[%c0_13, %c0_14] : memref<16x8xf32, #tpu.memory_space<vmem>>, vector<16x8xf32>
    tpu.vector_store %arg3[%c0_13, %c0_14], %58 {strides = array<i32>} : memref<16x8xf32, #tpu.memory_space<vmem>>, vector<16x8xf32>,
    return
  }
  func.func @transform_0(%arg0: i32) -> (i32, i32) {
    %c0_i32 = arith.constant 0 : i32
    %c0_i32_0 = arith.constant 0 : i32
    return %arg0, %c0_i32 : i32, i32
  }
  func.func @transform_1(%arg0: i32) -> (i32, i32) {
    %c0_i32 = arith.constant 0 : i32
    %c0_i32_0 = arith.constant 0 : i32
    return %arg0, %c0_i32 : i32, i32
  }
  func.func @transform_2(%arg0: i32) -> (i32, i32) {
    %c0_i32 = arith.constant 0 : i32
    %c0_i32_0 = arith.constant 0 : i32
    return %arg0, %c0_i32 : i32, i32
  }
}

</mosaic_0001>

<bundles_post_ra>
// kernel: tpu_custom_call.1
= control target key start
LH: loop header
LB: loop body
LE: loop exit
PB: predicated region body
PF: predicated region fallthrough
CT: control target
= control target key end

     0   :  { %vm29_vm0 = vcmask 80896   ;;  %v220_v2 = vmov 0   ;;  %v15_v6 = vlaneseq  ;;  %v221_v23 = vmov 0.0   ;;  %s223_s16 = smov 3   ;;  %s224_s17 = smov 5   ;;  %s298_s0 = inlined_call_operand.vmem [shape: f32[16,10], index: 0, kind: input, shape index: {}]   ;;  %s299_s1 = inlined_call_operand.vmem [shape: s32[16,1], index: 1, kind: input, shape index: {}]   ;;  %s300_s2 = inlined_call_operand.vmem [shape: f32[16,8], index: 2, kind: output, shape index: {}]  }
   0x1   :  { %v11_v0 = vld [vmem:[%s298_s0] sm:$0xff]  ;;  %v12_v1 = vld [vmem:[%s298_s0 + $0x8] sm:$0xff]  ;;  %193 = vset.pattern.permute.xlu0 %v220_v2  ;;  %194 = vset.pattern.permute.xlu1 %v220_v2  ;;  %vm152_vm7 = vcmask 7168   ;;  %vm155_vm8 = vcmask 15360   ;;  %vm158_vm9 = vcmask 23552   ;;  %vm161_vm10 = vcmask 31744  }
   0x2   :  { %v30_v3 = vsel %vm29_vm0, %v11_v0, -inf  ;;  %v33_v4 = vsel %vm29_vm0, %v12_v1, -inf  ;;  %v251_v5 = vld [vmem:[%s299_s1] sm:$0xff]  ;;  %v16_v8 = vand.u32 127, %v15_v6  ;;  %v14_v21 = vld [vmem:[%s299_s1 + $0x8] sm:$0xff]  ;;  %s222_s1 = smov 2  }
   0x3   :  { %31 = vmax.xlane.f32.xlu0 %v30_v3  ;;  %vm164_vm11 = vcmask 39936   ;;  %vm167_vm12 = vcmask 48128   ;;  %vm170_vm13 = vcmask 56320   ;;  %vm173_vm14 = vcmask 64512  }
   0x4   :  { %v70_v12 = vcvt.s32.f32 %v16_v8 }
   0x7   :  { %34 = vmax.xlane.f32.xlu0 %v33_v4 }
  0x1d   :  { %18 = vperm.xlu0 %193, %v251_v5  }
  0x90   :  { %v254_v7 = vpop.xlane.xlu0 %31 }
  0x91   :  { %v36_v9 = vsub.f32 %v11_v0, %v254_v7  ;;  %vm71_vm3 = vcmp.eq.f32.partialorder %v11_v0, %v254_v7 }
  0x92   :  { %v73_v25 = vsel %vm71_vm3, %v70_v12, 10.0 }
  0x93   :  { %v38_v10 = vmul.f32 1.442695, %v36_v9  ;;  %v75_v27 = vsel %vm29_vm0, %v73_v25, inf }
  0x94   :  { %v257_v11 = vpop.xlane.xlu0 %34 }
  0x95   :  { %200 = vpow2.f32 %v38_v10  ;;  %v37_v13 = vsub.f32 %v12_v1, %v257_v11  ;;  %vm72_vm1 = vcmp.eq.f32.partialorder %v12_v1, %v257_v11 }
  0x96   :  { %v74_v14 = vsel %vm72_vm1, %v70_v12, 10.0 }
  0x97   :  { %v40_v15 = vmul.f32 1.442695, %v37_v13  ;;  %v78_v16 = vsel %vm29_vm0, %v74_v14, inf }
  0x98   :  { %79 = vmin.xlane.f32.xlu0 %v78_v16 }
  0x99   :  { %202 = vpow2.f32 %v40_v15 }
  0x9c   :  { %v19_v22 = vpop.permute.xlu0 %18 }
  0x9d   :  { %vm23_vm2 = vcmp.eq.s32.totalorder %v16_v8, %v19_v22 }
  0x9e   :  { %v180_v24 = vsel %vm23_vm2, 1.0, %v221_v23 }
  0x9f   :  { %v201_v17 = vpop.eup %200  ;;  %v52_v26 = vmul.f32 %v180_v24, %v11_v0 }
  0xa0   :  { %v42_v18 = vsel %vm29_vm0, %v201_v17, 0.0 }
  0xa1   :  { %43 = vadd.xlane.f32.xlu1 %v42_v18  ;;  %v54_v28 = vsel %vm29_vm0, %v52_v26, 0.0 }
  0xa3   :  { %v203_v19 = vpop.eup %202 }
  0xa4   :  { %v45_v20 = vsel %vm29_vm0, %v203_v19, 0.0 }
  0xa5   :  { %46 = vadd.xlane.f32.xlu1 %v45_v20 }
  0xb6   :  { %21 = vperm.xlu1 %194, %v14_v21  }
  0xda   :  { %76 = vmin.xlane.f32.xlu1 %v75_v27 }
  0xde   :  { %55 = vadd.xlane.f32.xlu1 %v54_v28 }
 0x125   :  { %v80_v38 = vpop.xlane.xlu0 %79 }
 0x126   :  { %v186_v40 = vtrunc.f32 %v80_v38 }
 0x128   :  { %v187_v41 = vcvt.f32.s32 %v186_v40 }
 0x12a   :  { %vm84_vm5 = vcmp.eq.s32.totalorder %v187_v41, %v14_v21 }
 0x12b   :  { %v183_v45 = vsel %vm84_vm5, 1.0, %v221_v23 }
 0x12c   :  { %v109_v59 = vsub.f32 1.0, %v183_v45 }
 0x12e   :  { %v44_v29 = vpop.xlane.xlu1 %43 }
 0x132   :  { %v47_v30 = vpop.xlane.xlu1 %46 }
 0x133   :  { %204 = vlog2.f32 %v47_v30 }
 0x136   :  { %v22_v31 = vpop.permute.xlu1 %21 }
 0x137   :  { %vm24_vm4 = vcmp.eq.s32.totalorder %v16_v8, %v22_v31 }
 0x138   :  { %v181_v32 = vsel %vm24_vm4, 1.0, %v221_v23 }
 0x139   :  { %v53_v33 = vmul.f32 %v181_v32, %v12_v1 }
 0x13b   :  { %v57_v34 = vsel %vm29_vm0, %v53_v33, 0.0 }
 0x13c   :  { %58 = vadd.xlane.f32.xlu1 %v57_v34 }
 0x13d   :  { %v205_v35 = vpop.eup %204 }
 0x13e   :  { %v271_v36 = vmul.f32 0.6931472, %v205_v35 }
 0x140   :  { %v65_v37 = vsub.f32 0.0, %v271_v36  ;;  %v61_v22 = vadd.f32 %v271_v36, %v257_v11 }
 0x142   :  { %v68_v39 = vmul.f32 1.442695, %v65_v37 }
 0x144   :  { %206 = vpow2.f32 %v68_v39 }
 0x145   :  { %208 = vlog2.f32 %v44_v29 }
 0x14e   :  { %v274_v42 = vpop.eup %206 }
 0x14f   :  { %v105_v43 = vsub.f32 1.0, %v274_v42  ;;  %v209_v44 = vpop.eup %208  ;;  %v113_v60 = vmul.f32 %v274_v42, %v109_v59  ;;  %v115_v0 = vmul.f32 2.5, %v274_v42  ;;  %v121_v1 = vmul.f32 -2.5, %v274_v42 }
 0x150   :  { %v49_v47 = vmul.f32 0.6931472, %v209_v44 }
 0x151   :  { %v107_v46 = vmul.f32 %v183_v45, %v105_v43  ;;  %v118_v4 = vmul.f32 1.442695, %v115_v0  ;;  %v124_v6 = vmul.f32 1.442695, %v121_v1 }
 0x152   :  { %v64_v48 = vsub.f32 0.0, %v49_v47  ;;  %v60_v20 = vadd.f32 %v49_v47, %v254_v7 }
 0x153   :  { %132 = vrot.lane.b32.xlu0 %v107_v46, %s222_s1 }
 0x154   :  { %v66_v49 = vmul.f32 1.442695, %v64_v48 }
 0x156   :  { %210 = vpow2.f32 %v66_v49 }
 0x160   :  { %v277_v52 = vpop.eup %210 }
 0x161   :  { %v104_v54 = vsub.f32 1.0, %v277_v52  ;;  %v114_v62 = vmul.f32 2.5, %v277_v52  ;;  %v120_v63 = vmul.f32 -2.5, %v277_v52 }
 0x163   :  { %v116_v2 = vmul.f32 1.442695, %v114_v62  ;;  %v122_v3 = vmul.f32 1.442695, %v120_v63 }
 0x165   :  { %212 = vpow2.f32 %v116_v2 }
 0x166   :  { %214 = vpow2.f32 %v122_v3 }
 0x167   :  { %v77_v50 = vpop.xlane.xlu1 %76  ;;  %216 = vpow2.f32 %v118_v4 }
 0x168   :  { %v184_v51 = vtrunc.f32 %v77_v50  ;;  %218 = vpow2.f32 %v124_v6 }
 0x16a   :  { %v185_v53 = vcvt.f32.s32 %v184_v51 }
 0x16c   :  { %vm83_vm6 = vcmp.eq.s32.totalorder %v185_v53, %v251_v5  ;;  %v56_v5 = vpop.xlane.xlu1 %55 }
 0x16d   :  { %v182_v55 = vsel %vm83_vm6, 1.0, %v221_v23  ;;  %v62_v26 = vsub.f32 %v60_v20, %v56_v5 }
 0x16e   :  { %v106_v56 = vmul.f32 %v182_v55, %v104_v54  ;;  %v108_v57 = vsub.f32 1.0, %v182_v55  ;;  %v195_v61 = vpack.i.bf16 %v183_v45, %v182_v55 }
 0x16f   :  { %v213_v10 = vpop.eup %212 }
 0x170   :  { %130 = vrot.lane.b32.xlu1 %v106_v56, %s222_s1  ;;  %v112_v58 = vmul.f32 %v277_v52, %v108_v57  ;;  %v215_v12 = vpop.eup %214 }
 0x171   :  { %v217_v14 = vpop.eup %216  ;;  %v153_v19 = vsel %vm152_vm7, %v213_v10, %v215_v12 }
 0x172   :  { %v219_v15 = vpop.eup %218 }
 0x173   :  { %v154_v18 = vsel %vm152_vm7, %v217_v14, %v219_v15 }
 0x174   :  { %138 = vrot.lane.b32.xlu1 %v112_v58, %s223_s16 }
 0x178   :  { %140 = vrot.lane.b32.xlu1 %v113_v60, %s223_s16 }
 0x17c   :  { %196 = vrot.lane.b32.xlu1 %v195_v61, %s224_s17 }
 0x1c5   :  { %v133_v16 = vpop.permute.xlu0 %132 }
 0x1c6   :  { %v157_v21 = vsel %vm155_vm8, %v154_v18, %v133_v16 }
 0x1c9   :  { %v59_v8 = vpop.xlane.xlu1 %58 }
 0x1ca   :  { %v63_v27 = vsub.f32 %v61_v22, %v59_v8 }
 0x1e2   :  { %v131_v9 = vpop.permute.xlu1 %130 }
 0x1e3   :  { %v156_v23 = vsel %vm155_vm8, %v153_v19, %v131_v9 }
 0x1e6   :  { %v139_v13 = vpop.permute.xlu1 %138 }
 0x1e7   :  { %v159_v24 = vsel %vm158_vm9, %v156_v23, %v139_v13 }
 0x1e8   :  { %v162_v31 = vsel %vm161_vm10, %v159_v24, %v62_v26 }
 0x1ea   :  { %v141_v17 = vpop.permute.xlu1 %140 }
 0x1eb   :  { %v160_v25 = vsel %vm158_vm9, %v157_v21, %v141_v17 }
 0x1ec   :  { %v163_v32 = vsel %vm161_vm10, %v160_v25, %v63_v27 }
 0x1ee   :  { %v197_v28 = vpop.permute.xlu1 %196 }
 0x1ef   :  { %v199_v29 = vunpack.i.h.bf16 %v197_v28  ;;  %v198_v30 = vunpack.i.l.bf16 %v197_v28 }
 0x1f1   :  { %v165_v7 = vsel %vm164_vm11, %v162_v31, %v198_v30  ;;  %v166_v33 = vsel %vm164_vm11, %v163_v32, %v199_v29 }
 0x1f2   :  { %v168_v34 = vsel %vm167_vm12, %v165_v7, %v277_v52  ;;  %v169_v11 = vsel %vm167_vm12, %v166_v33, %v274_v42 }
 0x1f3   :  { %v171_v35 = vsel %vm170_vm13, %v168_v34, 1.0  ;;  %v172_v36 = vsel %vm170_vm13, %v169_v11, 1.0 }
 0x1f4   :  { %174 = vst.msk [vmem:[%s300_s2] sm:$0xff] %vm173_vm14, %v171_v35  ;;  %175 = vst.msk [vmem:[%s300_s2 + $0x8] sm:$0xff] %vm173_vm14, %v172_v36 }

</bundles_post_ra>
